<compile_context>
chip_gen: v6e
topology: v6e:2x2x1
jax: 0.10.0
libtpu: 0.0.40
codegen_flags: <defaults>
</compile_context>

<pallas_src>
import functools

import jax
import jax.numpy as jnp
from jax.experimental import pallas as pl
from jax.experimental.pallas import tpu as pltpu


# ---------------------------------------------------------------------------
# Main kernel: per-batch-tile reflection / alignment / confidence / LayerNorm
# plus a masked partial batch-sum (feeds the context mean for conflict scores).
# ---------------------------------------------------------------------------
def metacog_kernel(nrows, x_ref, prin_ref,
                   w_sr_ref, b_sr_ref,
                   w_aa_ref, b_aa_ref,
                   w_ce_ref, b_ce_ref,
                   ln_g_ref, ln_b_ref,
                   out_ref, conf_ref, xsum_ref):
    i = pl.program_id(0)
    x = x_ref[...].astype(jnp.float32)           # (TB, H) f32 for residual / LN
    tb = x.shape[0]

    # Masked partial batch-sum for the context mean. Edge-tile pad rows contain
    # undefined data: they are excluded here, and every other computation below
    # is strictly per-row (no cross-row reduction) with pad rows dropped on the
    # clipped output store, so the padding stays benign. Do NOT add a cross-row
    # reduction inside this kernel without masking it the same way.
    row_ids = jax.lax.broadcasted_iota(jnp.int32, (tb, 1), 0)
    valid = row_ids < (nrows - i * tb)
    xsum_ref[...] = jnp.sum(jnp.where(valid, x, 0.0), axis=0, keepdims=True)

    xb = x.astype(jnp.bfloat16)                  # bf16 MXU operand
    prin = prin_ref[...]                         # (P, H) bf16

    # --- self reflection: tanh(x @ Wsr + bsr) --- (bf16 MXU, f32 accumulate)
    reflection = jnp.tanh(
        jnp.dot(xb, w_sr_ref[...], preferred_element_type=jnp.float32)
        + b_sr_ref[...])                         # (TB, H) f32

    # --- principle weighting: softmax(x @ P^T) @ P ---
    # dot_general contracting last dims: no in-kernel transpose of `prin`.
    # NOTE: at P << 128 these two MXU passes waste most of their output width;
    # if a profile shows MXU-bound at large H, switch the logits to a VPU
    # broadcast-mul + lane-reduce per principle (like the confidence head).
    logits = jax.lax.dot_general(
        xb, prin, (((1,), (1,)), ((), ())),
        preferred_element_type=jnp.float32)      # (TB, P)
    logits = logits - jnp.max(logits, axis=-1, keepdims=True)
    e = jnp.exp(logits)
    pw = e * pl.reciprocal(jnp.sum(e, axis=-1, keepdims=True), approx=True)
    alignment = jnp.dot(pw.astype(jnp.bfloat16), prin,
                        preferred_element_type=jnp.float32)   # (TB, H)

    # --- adaptive alignment linear ---
    adaptive = (jnp.dot((reflection + alignment).astype(jnp.bfloat16),
                        w_aa_ref[...], preferred_element_type=jnp.float32)
                + b_aa_ref[...])                 # (TB, H) f32

    # --- confidence head: sigmoid(adaptive @ w_ce + b_ce), stored lane-dense
    # as a (1, TB) row (M=1 dot_general -> result lands directly on lanes; no
    # (TB,1) masked partial stores, no in-kernel transpose).
    conf_logit = jax.lax.dot_general(
        w_ce_ref[...], adaptive, (((1,), (1,)), ((), ())),
        preferred_element_type=jnp.float32) + b_ce_ref[...]   # (1, TB)
    conf_ref[...] = jax.nn.sigmoid(conf_logit)

    # --- LayerNorm(x + adaptive_reflection) ---
    y = x + adaptive
    mean = jnp.mean(y, axis=-1, keepdims=True)
    var = jnp.mean((y - mean) ** 2, axis=-1, keepdims=True)
    y_hat = (y - mean) * jax.lax.rsqrt(var + 1e-5)
    # TODO(synk): write `out` in bf16 if the surrounding model tolerates it
    # (halves the dominant HBM writeback); kept f32 to match the reference.
    out_ref[...] = y_hat * ln_g_ref[...] + ln_b_ref[...]


# ---------------------------------------------------------------------------
# Tiling / VMEM heuristics
# ---------------------------------------------------------------------------
def _round_up(v, m):
    return ((v + m - 1) // m) * m


def _pick_batch_tile(B, H):
    if B <= 16:
        return B                       # full-extent block, single grid step
    # >=2 grid steps so both v7x TensorCores get work; cap the tile when H is
    # large so f32 intermediates + double-buffered x/out stay modest.
    cap = 128 if H >= 2048 else 256
    tb = min(cap, _round_up(pl.cdiv(B, 2), 8))
    if tb >= 128:
        tb = (tb // 128) * 128         # multiple of 128 (v5e 4x128^2 MXU)
    return tb


def _vmem_limit_bytes(H, P, TB):
    # Single-buffered residents: two HxH bf16 weights, bf16 principles, f32 rows.
    resident = 2 * H * H * 2 + P * H * 2 + 6 * H * 4 + 8
    # Double-buffered streamed tiles: x + out (f32) + conf row + xsum row.
    streamed = 2 * (2 * TB * H * 4 + TB * 4 + H * 4)
    # Headroom for live f32 intermediates (reflection/alignment/adaptive/y) and
    # spill scratch.
    headroom = max(4 * 1024 * 1024, 6 * TB * H * 4)
    need = resident + streamed + headroom
    try:
        cap = pltpu.get_tpu_info().vmem_capacity_bytes   # 64 MiB v7x, 128 MiB v5e/v6e
    except Exception:
        cap = 64 * 1024 * 1024
    return int(min(max(need, 16 * 1024 * 1024), int(cap * 0.9)))


# ---------------------------------------------------------------------------
# Wrapper
# ---------------------------------------------------------------------------
def metacognition_forward(x, params):
    """Returns (output, confidence, conflict_scores) as device arrays.

    No host sync happens here; use extract_conflicts() to materialize the
    data-dependent Python list of conflicts when actually needed.
    """
    B, H = x.shape
    P = params["principles"].shape[0]
    TB = _pick_batch_tile(B, H)
    num_tiles = pl.cdiv(B, TB)

    # Grid-invariant operands: constant index_map + single buffering.
    resident = lambda shape: pl.BlockSpec(
        shape, lambda i: (0, 0), pipeline_mode=pl.Buffered(1))

    out, conf_rows, xsum = pl.pallas_call(
        functools.partial(metacog_kernel, B),
        out_shape=(
            jax.ShapeDtypeStruct((B, H), jnp.float32),          # layer-normed output
            jax.ShapeDtypeStruct((num_tiles, TB), jnp.float32),  # confidence (lane-dense)
            jax.ShapeDtypeStruct((num_tiles, H), jnp.float32),   # per-tile batch sums
        ),
        grid=(num_tiles,),
        in_specs=[
            pl.BlockSpec((TB, H), lambda i: (i, 0)),     # x (batch-tiled)
            resident((P, H)),                            # principles (bf16)
            resident((H, H)), resident((1, H)),          # w_sr, b_sr
            resident((H, H)), resident((1, H)),          # w_aa, b_aa
            resident((1, H)), resident((1, 1)),          # w_ce_row, b_ce
            resident((1, H)), resident((1, H)),          # ln_g, ln_b
        ],
        out_specs=(
            pl.BlockSpec((TB, H), lambda i: (i, 0)),
            pl.BlockSpec((1, TB), lambda i: (i, 0)),
            pl.BlockSpec((1, H), lambda i: (i, 0)),
        ),
        compiler_params=pltpu.CompilerParams(
            dimension_semantics=("parallel",),
            vmem_limit_bytes=_vmem_limit_bytes(H, P, TB),
        ),
    )(
        x,
        params["principles"],
        params["w_sr"], params["b_sr"],
        params["w_aa"], params["b_aa"],
        params["w_ce_row"], params["b_ce"],
        params["ln_g"], params["ln_b"],
    )

    # Flatten the lane-dense confidence rows back to (B, 1); edge-tile pad
    # columns (garbage) are sliced off here.
    confidence = conf_rows.reshape(-1)[:B].reshape(B, 1)

    # Context mean from the in-kernel partial sums (no second HBM pass over x),
    # then the conflict scores |dot(normalize(ctx), proj_i - proj_j)| = |s_i - s_j|
    # in plain XLA (tiny: launch overhead would dwarf the math as a kernel).
    ctx = jnp.sum(xsum, axis=0, keepdims=True) / B          # (1, H)
    norm = jnp.sqrt(jnp.sum(ctx * ctx, axis=-1, keepdims=True))
    ctx_n = ctx / jnp.maximum(norm, 1e-12)                   # F.normalize
    s = jnp.sum(params["proj"] * ctx_n, axis=-1, keepdims=True)   # (P, 1)
    scores = jnp.abs(s - s.T)                                # (P, P)

    return out, confidence, scores


def extract_conflicts(scores, threshold=0.5):
    """Host-side, lazy construction of the data-dependent conflicts list.

    This is the only place that syncs with the device; call it at whatever
    cadence the surrounding code actually needs the Python list.
    """
    scores_np = jax.device_get(scores)
    P = scores_np.shape[0]
    conflicts = []
    for i in range(P):
        for j in range(i + 1, P):
            s = float(scores_np[i, j])
            if s > threshold:
                conflicts.append((i, j, s))
    return conflicts


# ---------------------------------------------------------------------------
# Parameters (deterministic init mimicking nn.Linear uniform +-1/sqrt(fan_in))
# ---------------------------------------------------------------------------
def prepare_params(raw):
    """One-time prep: hoist the input-independent context projection of the
    principles and cast MXU weights to bf16 (f32 accumulation in-kernel).
    NOTE: bf16 weights/principles + approx reciprocal in the softmax deviate
    slightly from the f32 PyTorch reference; validate with a tolerance."""
    H = raw["w_sr"].shape[0]
    proj = (jnp.dot(raw["principles"], raw["w_cp"],
                    preferred_element_type=jnp.float32)
            + raw["b_cp"])                                # (P, H), computed once
    return {
        "w_sr": raw["w_sr"].astype(jnp.bfloat16),
        "b_sr": raw["b_sr"],
        "w_aa": raw["w_aa"].astype(jnp.bfloat16),
        "b_aa": raw["b_aa"],
        "w_ce_row": raw["w_ce"].T,                        # (1, H) f32
        "b_ce": raw["b_ce"],                              # (1, 1)
        "ln_g": raw["ln_g"].reshape(1, H).astype(jnp.float32),
        "ln_b": raw["ln_b"].reshape(1, H).astype(jnp.float32),
        "principles": raw["principles"].astype(jnp.bfloat16),
        "proj": proj.astype(jnp.float32),
    }


def init_params(key, hidden_dim, num_principles):
    ks = jax.random.split(key, 10)
    bound = 1.0 / (hidden_dim ** 0.5)

    def lin(kw, kb, out_dim):
        # stored pre-transposed as (in, out)
        w = jax.random.uniform(kw, (hidden_dim, out_dim), jnp.float32, -bound, bound)
        b = jax.random.uniform(kb, (1, out_dim), jnp.float32, -bound, bound)
        return w, b

    w_sr, b_sr = lin(ks[0], ks[1], hidden_dim)   # self_reflection
    w_ce, b_ce = lin(ks[2], ks[3], 1)            # confidence_estimation
    w_cp, b_cp = lin(ks[4], ks[5], hidden_dim)   # context_projection
    w_aa, b_aa = lin(ks[6], ks[7], hidden_dim)   # adaptive_alignment
    principles = jax.random.normal(ks[8], (num_principles, hidden_dim), jnp.float32)

    raw = {
        "w_sr": w_sr, "b_sr": b_sr,
        "w_ce": w_ce, "b_ce": b_ce,
        "w_cp": w_cp, "b_cp": b_cp,
        "w_aa": w_aa, "b_aa": b_aa,
        "ln_g": jnp.ones((hidden_dim,), jnp.float32),     # fresh nn.LayerNorm init
        "ln_b": jnp.zeros((hidden_dim,), jnp.float32),
        "principles": principles,
    }
    return prepare_params(raw)


if __name__ == "__main__":
    key = jax.random.PRNGKey(0)
    k_x, k_p = jax.random.split(key)

    batch, hidden_dim, num_principles = 2, 32, 4
    x = jax.random.normal(k_x, (batch, hidden_dim), jnp.float32)
    params = init_params(k_p, hidden_dim, num_principles)

    fwd = jax.jit(metacognition_forward)
    out, conf, scores = fwd(x, params)
    jax.block_until_ready((out, conf, scores))

    # Data-dependent Python list built lazily (single host sync, outside forward).
    conflicts = extract_conflicts(scores, threshold=0.5)

    assert out.shape == (batch, hidden_dim)
    assert conf.shape == (batch, 1)
    assert scores.shape == (num_principles, num_principles)
    assert isinstance(conflicts, list)

    print("KERNEL_OK")
</pallas_src>

<mosaic_0001>
module attributes {stable_mosaic.version = 11 : i64} {
  func.func @metacog_kernel(%arg0: i32, %arg1: memref<2x32xf32, #tpu.memory_space<vmem>>, %arg2: memref<4x32xbf16, #tpu.memory_space<vmem>>, %arg3: memref<32x32xbf16, #tpu.memory_space<vmem>>, %arg4: memref<1x32xf32, #tpu.memory_space<vmem>>, %arg5: memref<32x32xbf16, #tpu.memory_space<vmem>>, %arg6: memref<1x32xf32, #tpu.memory_space<vmem>>, %arg7: memref<1x32xf32, #tpu.memory_space<vmem>>, %arg8: memref<1x1xf32, #tpu.memory_space<vmem>>, %arg9: memref<1x32xf32, #tpu.memory_space<vmem>>, %arg10: memref<1x32xf32, #tpu.memory_space<vmem>>, %arg11: memref<2x32xf32, #tpu.memory_space<vmem>>, %arg12: memref<1x2xf32, #tpu.memory_space<vmem>>, %arg13: memref<1x32xf32, #tpu.memory_space<vmem>>) attributes {dimension_semantics = [#tpu.dimension_semantics<parallel>], iteration_bounds = array<i64: 1>, scalar_prefetch = 0 : i64, scratch_operands = 0 : i64, tpu.core_type = #tpu.core_type<tc>, window_params = [{transform_indices = @transform_0, window_bounds = array<i64: 2, 32>}, {pipeline_mode = #tpu.pipeline_mode<synchronous>, transform_indices = @transform_1, window_bounds = array<i64: 4, 32>}, {pipeline_mode = #tpu.pipeline_mode<synchronous>, transform_indices = @transform_2, window_bounds = array<i64: 32, 32>}, {pipeline_mode = #tpu.pipeline_mode<synchronous>, transform_indices = @transform_3, window_bounds = array<i64: 1, 32>}, {pipeline_mode = #tpu.pipeline_mode<synchronous>, transform_indices = @transform_4, window_bounds = array<i64: 32, 32>}, {pipeline_mode = #tpu.pipeline_mode<synchronous>, transform_indices = @transform_5, window_bounds = array<i64: 1, 32>}, {pipeline_mode = #tpu.pipeline_mode<synchronous>, transform_indices = @transform_6, window_bounds = array<i64: 1, 32>}, {pipeline_mode = #tpu.pipeline_mode<synchronous>, transform_indices = @transform_7, window_bounds = array<i64: 1, 1>}, {pipeline_mode = #tpu.pipeline_mode<synchronous>, transform_indices = @transform_8, window_bounds = array<i64: 1, 32>}, {pipeline_mode = #tpu.pipeline_mode<synchronous>, transform_indices = @transform_9, window_bounds = array<i64: 1, 32>}, {transform_indices = @transform_10, window_bounds = array<i64: 2, 32>}, {transform_indices = @transform_11, window_bounds = array<i64: 1, 2>}, {transform_indices = @transform_12, window_bounds = array<i64: 1, 32>}]} {
    %c0 = arith.constant 0 : index
    %c0_0 = arith.constant 0 : index
    %0 = vector.load %arg1[%c0, %c0_0] : memref<2x32xf32, #tpu.memory_space<vmem>>, vector<2x32xf32>
    %1 = tpu.iota {dimensions = array<i32: 0>} : vector<2x1xi32>
    %c2_i32 = arith.constant 2 : i32
    %2 = arith.muli %arg0, %c2_i32 : i32
    %c2_i32_1 = arith.constant 2 : i32
    %3 = arith.subi %c2_i32_1, %2 : i32
    %4 = vector.broadcast %3 : i32 to vector<2x1xi32>
    %5 = arith.cmpi slt, %1, %4 : vector<2x1xi32>
    %cst = arith.constant 0.000000e+00 : f32
    %6 = vector.shape_cast %5 : vector<2x1xi1> to vector<2x1xi1>
    %7 = vector.broadcast %6 : vector<2x1xi1> to vector<2x32xi1>
    %8 = vector.broadcast %cst : f32 to vector<2x32xf32>
    %9 = arith.select %7, %0, %8 : vector<2x32xi1>, vector<2x32xf32>
    %cst_2 = arith.constant dense<0.000000e+00> : vector<32xf32>
    %10 = vector.multi_reduction <add>, %9, %cst_2 [0] : vector<2x32xf32> to vector<32xf32>
    %11 = vector.shape_cast %10 : vector<32xf32> to vector<1x32xf32>
    %c0_3 = arith.constant 0 : index
    %c0_4 = arith.constant 0 : index
    %12 = vector.load %arg13[%c0_3, %c0_4] : memref<1x32xf32, #tpu.memory_space<vmem>>, vector<1x32xf32>
    tpu.vector_store %arg13[%c0_3, %c0_4], %11 {strides = array<i32>} : memref<1x32xf32, #tpu.memory_space<vmem>>, vector<1x32xf32>,
    %13 = arith.truncf %0 : vector<2x32xf32> to vector<2x32xbf16>
    %c0_5 = arith.constant 0 : index
    %c0_6 = arith.constant 0 : index
    %14 = vector.load %arg2[%c0_5, %c0_6] : memref<4x32xbf16, #tpu.memory_space<vmem>>, vector<4x32xbf16>
    %c0_7 = arith.constant 0 : index
    %c0_8 = arith.constant 0 : index
    %15 = vector.load %arg3[%c0_7, %c0_8] : memref<32x32xbf16, #tpu.memory_space<vmem>>, vector<32x32xbf16>
    %cst_9 = arith.constant dense<0.000000e+00> : vector<2x32xf32>
    %16 = tpu.matmul %13, %15, %cst_9 {dimension_numbers = #tpu.dot_dimension_numbers<[1], [0], [0], [1], [0, 0, 1, 1], [], []>} : vector<2x32xbf16>, vector<32x32xbf16>, vector<2x32xf32> -> vector<2x32xf32>
    %c0_10 = arith.constant 0 : index
    %c0_11 = arith.constant 0 : index
    %17 = vector.load %arg4[%c0_10, %c0_11] : memref<1x32xf32, #tpu.memory_space<vmem>>, vector<1x32xf32>
    %18 = vector.broadcast %17 : vector<1x32xf32> to vector<2x32xf32>
    %19 = arith.addf %16, %18 : vector<2x32xf32>
    %20 = math.tanh %19 : vector<2x32xf32>
    %cst_12 = arith.constant dense<0.000000e+00> : vector<2x4xf32>
    %21 = tpu.matmul %13, %14, %cst_12 {dimension_numbers = #tpu.dot_dimension_numbers<[1], [1], [0], [0], [0, 0, 1, 0], [], []>} : vector<2x32xbf16>, vector<4x32xbf16>, vector<2x4xf32> -> vector<2x4xf32>
    %cst_13 = arith.constant dense<0xFF800000> : vector<2xf32>
    %22 = vector.multi_reduction <maximumf>, %21, %cst_13 [1] : vector<2x4xf32> to vector<2xf32>
    %23 = vector.shape_cast %22 : vector<2xf32> to vector<2x1xf32>
    %24 = vector.broadcast %23 : vector<2x1xf32> to vector<2x4xf32>
    %25 = arith.subf %21, %24 : vector<2x4xf32>
    %26 = math.exp %25 : vector<2x4xf32>
    %cst_14 = arith.constant dense<0.000000e+00> : vector<2xf32>
    %27 = vector.multi_reduction <add>, %26, %cst_14 [1] : vector<2x4xf32> to vector<2xf32>
    %28 = vector.shape_cast %27 : vector<2xf32> to vector<2x1xf32>
    %29 = tpu.reciprocal %28 {approx = true} : vector<2x1xf32> -> vector<2x1xf32>
    %30 = vector.broadcast %29 : vector<2x1xf32> to vector<2x4xf32>
    %31 = arith.mulf %26, %30 : vector<2x4xf32>
    %32 = arith.truncf %31 : vector<2x4xf32> to vector<2x4xbf16>
    %cst_15 = arith.constant dense<0.000000e+00> : vector<2x32xf32>
    %33 = tpu.matmul %32, %14, %cst_15 {dimension_numbers = #tpu.dot_dimension_numbers<[1], [0], [0], [1], [0, 0, 1, 1], [], []>} : vector<2x4xbf16>, vector<4x32xbf16>, vector<2x32xf32> -> vector<2x32xf32>
    %34 = arith.addf %20, %33 : vector<2x32xf32>
    %35 = arith.truncf %34 : vector<2x32xf32> to vector<2x32xbf16>
    %c0_16 = arith.constant 0 : index
    %c0_17 = arith.constant 0 : index
    %36 = vector.load %arg5[%c0_16, %c0_17] : memref<32x32xbf16, #tpu.memory_space<vmem>>, vector<32x32xbf16>
    %cst_18 = arith.constant dense<0.000000e+00> : vector<2x32xf32>
    %37 = tpu.matmul %35, %36, %cst_18 {dimension_numbers = #tpu.dot_dimension_numbers<[1], [0], [0], [1], [0, 0, 1, 1], [], []>} : vector<2x32xbf16>, vector<32x32xbf16>, vector<2x32xf32> -> vector<2x32xf32>
    %c0_19 = arith.constant 0 : index
    %c0_20 = arith.constant 0 : index
    %38 = vector.load %arg6[%c0_19, %c0_20] : memref<1x32xf32, #tpu.memory_space<vmem>>, vector<1x32xf32>
    %39 = vector.broadcast %38 : vector<1x32xf32> to vector<2x32xf32>
    %40 = arith.addf %37, %39 : vector<2x32xf32>
    %c0_21 = arith.constant 0 : index
    %c0_22 = arith.constant 0 : index
    %41 = vector.load %arg7[%c0_21, %c0_22] : memref<1x32xf32, #tpu.memory_space<vmem>>, vector<1x32xf32>
    %cst_23 = arith.constant dense<0.000000e+00> : vector<1x2xf32>
    %42 = tpu.matmul %41, %40, %cst_23 {dimension_numbers = #tpu.dot_dimension_numbers<[1], [1], [0], [0], [0, 0, 1, 0], [], []>} : vector<1x32xf32>, vector<2x32xf32>, vector<1x2xf32> -> vector<1x2xf32>
    %c0_24 = arith.constant 0 : index
    %c0_25 = arith.constant 0 : index
    %43 = vector.load %arg8[%c0_24, %c0_25] : memref<1x1xf32, #tpu.memory_space<vmem>>, vector<1x1xf32>
    %44 = vector.broadcast %43 : vector<1x1xf32> to vector<1x2xf32>
    %45 = arith.addf %42, %44 : vector<1x2xf32>
    %46 = arith.negf %45 : vector<1x2xf32>
    %47 = math.exp %46 : vector<1x2xf32>
    %cst_26 = arith.constant 1.000000e+00 : f32
    %48 = vector.broadcast %cst_26 : f32 to vector<1x2xf32>
    %49 = arith.addf %48, %47 : vector<1x2xf32>
    %50 = arith.divf %48, %49 : vector<1x2xf32>
    %c0_27 = arith.constant 0 : index
    %c0_28 = arith.constant 0 : index
    %51 = vector.load %arg12[%c0_27, %c0_28] : memref<1x2xf32, #tpu.memory_space<vmem>>, vector<1x2xf32>
    tpu.vector_store %arg12[%c0_27, %c0_28], %50 {strides = array<i32>} : memref<1x2xf32, #tpu.memory_space<vmem>>, vector<1x2xf32>,
    %52 = arith.addf %0, %40 : vector<2x32xf32>
    %cst_29 = arith.constant dense<0.000000e+00> : vector<2xf32>
    %53 = vector.multi_reduction <add>, %52, %cst_29 [1] : vector<2x32xf32> to vector<2xf32>
    %54 = vector.shape_cast %53 : vector<2xf32> to vector<2x1xf32>
    %cst_30 = arith.constant 3.200000e+01 : f32
    %55 = vector.broadcast %cst_30 : f32 to vector<2x1xf32>
    %56 = arith.divf %54, %55 : vector<2x1xf32>
    %57 = vector.broadcast %56 : vector<2x1xf32> to vector<2x32xf32>
    %58 = arith.subf %52, %57 : vector<2x32xf32>
    %59 = arith.mulf %58, %58 : vector<2x32xf32>
    %cst_31 = arith.constant dense<0.000000e+00> : vector<2xf32>
    %60 = vector.multi_reduction <add>, %59, %cst_31 [1] : vector<2x32xf32> to vector<2xf32>
    %61 = vector.shape_cast %60 : vector<2xf32> to vector<2x1xf32>
    %cst_32 = arith.constant 3.200000e+01 : f32
    %62 = vector.broadcast %cst_32 : f32 to vector<2x1xf32>
    %63 = arith.divf %61, %62 : vector<2x1xf32>
    %64 = vector.broadcast %56 : vector<2x1xf32> to vector<2x32xf32>
    %65 = arith.subf %52, %64 : vector<2x32xf32>
    %cst_33 = arith.constant 9.99999974E-6 : f32
    %66 = vector.broadcast %cst_33 : f32 to vector<2x1xf32>
    %67 = arith.addf %63, %66 : vector<2x1xf32>
    %68 = math.rsqrt %67 : vector<2x1xf32>
    %69 = vector.broadcast %68 : vector<2x1xf32> to vector<2x32xf32>
    %70 = arith.mulf %65, %69 : vector<2x32xf32>
    %c0_34 = arith.constant 0 : index
    %c0_35 = arith.constant 0 : index
    %71 = vector.load %arg9[%c0_34, %c0_35] : memref<1x32xf32, #tpu.memory_space<vmem>>, vector<1x32xf32>
    %72 = vector.broadcast %71 : vector<1x32xf32> to vector<2x32xf32>
    %73 = arith.mulf %70, %72 : vector<2x32xf32>
    %c0_36 = arith.constant 0 : index
    %c0_37 = arith.constant 0 : index
    %74 = vector.load %arg10[%c0_36, %c0_37] : memref<1x32xf32, #tpu.memory_space<vmem>>, vector<1x32xf32>
    %75 = vector.broadcast %74 : vector<1x32xf32> to vector<2x32xf32>
    %76 = arith.addf %73, %75 : vector<2x32xf32>
    %c0_38 = arith.constant 0 : index
    %c0_39 = arith.constant 0 : index
    %77 = vector.load %arg11[%c0_38, %c0_39] : memref<2x32xf32, #tpu.memory_space<vmem>>, vector<2x32xf32>
    tpu.vector_store %arg11[%c0_38, %c0_39], %76 {strides = array<i32>} : memref<2x32xf32, #tpu.memory_space<vmem>>, vector<2x32xf32>,
    return
  }
  func.func @transform_0(%arg0: i32) -> (i32, i32) {
    %c0_i32 = arith.constant 0 : i32
    %c0_i32_0 = arith.constant 0 : i32
    return %arg0, %c0_i32 : i32, i32
  }
  func.func @transform_1(%arg0: i32) -> (i32, i32) {
    %c0_i32 = arith.constant 0 : i32
    %c0_i32_0 = arith.constant 0 : i32
    %c0_i32_1 = arith.constant 0 : i32
    return %c0_i32, %c0_i32_0 : i32, i32
  }
  func.func @transform_2(%arg0: i32) -> (i32, i32) {
    %c0_i32 = arith.constant 0 : i32
    %c0_i32_0 = arith.constant 0 : i32
    %c0_i32_1 = arith.constant 0 : i32
    return %c0_i32, %c0_i32_0 : i32, i32
  }
  func.func @transform_3(%arg0: i32) -> (i32, i32) {
    %c0_i32 = arith.constant 0 : i32
    %c0_i32_0 = arith.constant 0 : i32
    %c0_i32_1 = arith.constant 0 : i32
    return %c0_i32, %c0_i32_0 : i32, i32
  }
  func.func @transform_4(%arg0: i32) -> (i32, i32) {
    %c0_i32 = arith.constant 0 : i32
    %c0_i32_0 = arith.constant 0 : i32
    %c0_i32_1 = arith.constant 0 : i32
    return %c0_i32, %c0_i32_0 : i32, i32
  }
  func.func @transform_5(%arg0: i32) -> (i32, i32) {
    %c0_i32 = arith.constant 0 : i32
    %c0_i32_0 = arith.constant 0 : i32
    %c0_i32_1 = arith.constant 0 : i32
    return %c0_i32, %c0_i32_0 : i32, i32
  }
  func.func @transform_6(%arg0: i32) -> (i32, i32) {
    %c0_i32 = arith.constant 0 : i32
    %c0_i32_0 = arith.constant 0 : i32
    %c0_i32_1 = arith.constant 0 : i32
    return %c0_i32, %c0_i32_0 : i32, i32
  }
  func.func @transform_7(%arg0: i32) -> (i32, i32) {
    %c0_i32 = arith.constant 0 : i32
    %c0_i32_0 = arith.constant 0 : i32
    %c0_i32_1 = arith.constant 0 : i32
    return %c0_i32, %c0_i32_0 : i32, i32
  }
  func.func @transform_8(%arg0: i32) -> (i32, i32) {
    %c0_i32 = arith.constant 0 : i32
    %c0_i32_0 = arith.constant 0 : i32
    %c0_i32_1 = arith.constant 0 : i32
    return %c0_i32, %c0_i32_0 : i32, i32
  }
  func.func @transform_9(%arg0: i32) -> (i32, i32) {
    %c0_i32 = arith.constant 0 : i32
    %c0_i32_0 = arith.constant 0 : i32
    %c0_i32_1 = arith.constant 0 : i32
    return %c0_i32, %c0_i32_0 : i32, i32
  }
  func.func @transform_10(%arg0: i32) -> (i32, i32) {
    %c0_i32 = arith.constant 0 : i32
    %c0_i32_0 = arith.constant 0 : i32
    return %arg0, %c0_i32 : i32, i32
  }
  func.func @transform_11(%arg0: i32) -> (i32, i32) {
    %c0_i32 = arith.constant 0 : i32
    %c0_i32_0 = arith.constant 0 : i32
    return %arg0, %c0_i32 : i32, i32
  }
  func.func @transform_12(%arg0: i32) -> (i32, i32) {
    %c0_i32 = arith.constant 0 : i32
    %c0_i32_0 = arith.constant 0 : i32
    return %arg0, %c0_i32 : i32, i32
  }
}

</mosaic_0001>

<bundles_post_ra>
// kernel: metacognition_forward.1
= control target key start
LH: loop header
LB: loop body
LE: loop exit
PB: predicated region body
PF: predicated region fallthrough
CT: control target
= control target key end

     0   :  { %s978_s0 = inlined_call_operand.vmem [shape: f32[2,32], index: 0, kind: input, shape index: {}]   ;;  %s979_s1 = inlined_call_operand.hbm [shape: bf16[4,32], index: 1, kind: input, shape index: {}]   ;;  %s980_s2 = inlined_call_operand.vmem [shape: bf16[32,32], index: 2, kind: input, shape index: {}]   ;;  %s981_s3 = inlined_call_operand.hbm [shape: f32[1,32], index: 3, kind: input, shape index: {}]   ;;  %s982_s4 = inlined_call_operand.hbm [shape: bf16[32,32], index: 4, kind: input, shape index: {}]   ;;  %s983_s5 = inlined_call_operand.hbm [shape: f32[1,32], index: 5, kind: input, shape index: {}]   ;;  %s984_s6 = inlined_call_operand.hbm [shape: f32[1,32], index: 6, kind: input, shape index: {}]   ;;  %s985_s7 = inlined_call_operand.<no memory space> [shape: f32[1,1], index: 7, kind: input, shape index: {}]   ;;  %s986_s8 = inlined_call_operand.hbm [shape: f32[1,32], index: 8, kind: input, shape index: {}]   ;;  %s987_s9 = inlined_call_operand.hbm [shape: f32[1,32], index: 9, kind: input, shape index: {}]   ;;  %s988_s10 = inlined_call_operand.hbm [shape: f32[2,32], index: 10, kind: output, shape index: {0}]   ;;  %s989_s11 = inlined_call_operand.hbm [shape: f32[1,2], index: 11, kind: output, shape index: {1}]   ;;  %s990_s12 = inlined_call_operand.vmem [shape: f32[1,32], index: 12, kind: output, shape index: {2}]  }
   0x1   :  { %v18_v0 = vstv %s985_s7 }
   0x2   :  { %19 = vst [vmem:[#allocation2] sm:$0x1] %v18_v0 }
   0x3   :  { %20 = vsyncpa [#allocation4], 0 }
   0x4   :  { %21 = vsyncpa [#allocation7], 0 }
   0x5   :  { %22 = vsyncpa [#allocation10], 0 }
   0x6   :  { %23 = vsyncpa [#allocation13], 0 }
   0x7   :  { %24 = vsyncpa [#allocation5], 0 }
   0x8   :  { %25 = vsyncpa [#allocation17], 0  ;;  %s834_s23 = smov [#allocation6]   ;;  %s835_s25 = smov [#allocation9]  }
   0x9   :  { %s46_s24 = sshll.u32 %s834_s23, 4  ;;  %s68_s26 = sshll.u32 %s835_s25, 4  ;;  %s47_s24 = int_to_ptr.vmem [resolvable:$true] %s46_s24  ;;  %s69_s26 = int_to_ptr.vmem [resolvable:$true] %s68_s26 }
   0xa   :  { %s650_s27 = scalar_lea.vmem %s47_s24, 16  ;;  %s654_s28 = scalar_lea.vmem %s47_s24, 32 }
   0xb   :  { %p651_p0 = scmp.ne.s32.totalorder %s47_s24, %s650_s27  ;;  %p655_p1 = scmp.lt.s32.totalorder %s47_s24, %s47_s24 }
   0xc   :  { %p656_p2 = scmp.lt.s32.totalorder %s654_s28, %s650_s27 }
   0xe   :  { %p657_p3 = por %p656_p2, %p655_p1 }
  0x10   :  { %p658_p4 = pnand %p657_p3, %p651_p0 }
  0x12   :  { %661 = shalt.err (!%p658_p4)
}
  0x13   :  { %49 = dma.hbm_to_vmem [thread:$0]  %s981_s3, 16, %s47_s24, [#allocation7]  }
  0x14   :  { %s670_s30 = scalar_lea.vmem %s69_s26, 16  ;;  %s674_s13 = scalar_lea.vmem %s69_s26, 32 }
  0x15   :  { %p671_p5 = scmp.ne.s32.totalorder %s69_s26, %s670_s30  ;;  %p675_p6 = scmp.lt.s32.totalorder %s69_s26, %s69_s26 }
  0x16   :  { %p676_p7 = scmp.lt.s32.totalorder %s674_s13, %s670_s30 }
  0x18   :  { %p677_p8 = por %p676_p7, %p675_p6 }
  0x1a   :  { %p678_p9 = pnand %p677_p8, %p671_p5 }
  0x1c   :  { %681 = shalt.err (!%p678_p9)
}
  0x1d   :  { %71 = dma.hbm_to_vmem [thread:$0]  %s983_s5, 16, %s69_s26, [#allocation10]  }
  0x1e   :  { %s836_s16 = smov [#allocation12]   ;;  %s837_s18 = smov [#allocation3]  }
  0x1f   :  { %s90_s17 = sshll.u32 %s836_s16, 4  ;;  %s34_s19 = sshll.u32 %s837_s18, 4  ;;  %s91_s17 = int_to_ptr.vmem [resolvable:$true] %s90_s17  ;;  %s35_s19 = int_to_ptr.vmem [resolvable:$true] %s34_s19 }
  0x20   :  { %s690_s20 = scalar_lea.vmem %s91_s17, 16  ;;  %s694_s3 = scalar_lea.vmem %s91_s17, 32 }
  0x21   :  { %p691_p10 = scmp.ne.s32.totalorder %s91_s17, %s690_s20  ;;  %p695_p11 = scmp.lt.s32.totalorder %s91_s17, %s91_s17 }
  0x22   :  { %p696_p12 = scmp.lt.s32.totalorder %s694_s3, %s690_s20 }
  0x24   :  { %p697_p13 = por %p696_p12, %p695_p11 }
  0x26   :  { %p698_p0 = pnand %p697_p13, %p691_p10 }
  0x28   :  { %701 = shalt.err (!%p698_p0)
}
  0x29   :  { %93 = dma.hbm_to_vmem [thread:$0]  %s986_s8, 16, %s91_s17, [#allocation13]  }
  0x2a   :  { %s710_s23 = scalar_lea.vmem %s35_s19, 32  ;;  %p715_p2 = scmp.lt.s32.totalorder %s35_s19, %s35_s19 }
  0x2b   :  { %p711_p1 = scmp.ne.s32.totalorder %s35_s19, %s710_s23  ;;  %p716_p3 = scmp.lt.s32.totalorder %s710_s23, %s710_s23 }
  0x2d   :  { %p717_p4 = por %p716_p3, %p715_p2 }
  0x2f   :  { %p718_p5 = pnand %p717_p4, %p711_p1 }
  0x31   :  { %721 = shalt.err (!%p718_p5)
}
  0x32   :  { %37 = dma.hbm_to_vmem [thread:$0]  %s979_s1, 32, %s35_s19, [#allocation4]  }
  0x33   :  { %s838_s25 = smov [#allocation8]  }
  0x34   :  { %s55_s26 = sshll.u32 %s838_s25, 4  ;;  %s56_s26 = int_to_ptr.vmem [resolvable:$true] %s55_s26 }
  0x35   :  { %s730_s27 = scalar_lea.vmem %s56_s26, 256  ;;  %p735_p7 = scmp.lt.s32.totalorder %s56_s26, %s56_s26 }
  0x36   :  { %p731_p6 = scmp.ne.s32.totalorder %s56_s26, %s730_s27  ;;  %p736_p8 = scmp.lt.s32.totalorder %s730_s27, %s730_s27 }
  0x38   :  { %p737_p9 = por %p736_p8, %p735_p7 }
  0x3a   :  { %p738_p10 = pnand %p737_p9, %p731_p6 }
  0x3c   :  { %741 = shalt.err (!%p738_p10)
}
  0x3d   :  { %s839_s8 = smov 64   ;;  %s840_s28 = smov 4  }
  0x3e   :  { %61 = dma.hbm_to_vmem [thread:$0]  %s982_s4, 256, %s56_s26, [#allocation7], %s839_s8, %s839_s8, %s840_s28  }
  0x3f   :  { %s841_s30 = smov [#allocation11]   ;;  %s842_s1 = smov [#allocation14]  }
  0x40   :  { %s78_s13 = sshll.u32 %s841_s30, 4  ;;  %s100_s14 = sshll.u32 %s842_s1, 4  ;;  %s79_s13 = int_to_ptr.vmem [resolvable:$true] %s78_s13  ;;  %s101_s14 = int_to_ptr.vmem [resolvable:$true] %s100_s14 }
  0x41   :  { %s750_s15 = scalar_lea.vmem %s79_s13, 16  ;;  %s754_s16 = scalar_lea.vmem %s79_s13, 32 }
  0x42   :  { %p751_p11 = scmp.ne.s32.totalorder %s79_s13, %s750_s15  ;;  %p755_p12 = scmp.lt.s32.totalorder %s79_s13, %s79_s13 }
  0x43   :  { %p756_p13 = scmp.lt.s32.totalorder %s754_s16, %s750_s15 }
  0x45   :  { %p757_p0 = por %p756_p13, %p755_p12 }
  0x47   :  { %p758_p1 = pnand %p757_p0, %p751_p11 }
  0x49   :  { %761 = shalt.err (!%p758_p1)
}
  0x4a   :  { %81 = dma.hbm_to_vmem [thread:$0]  %s984_s6, 16, %s79_s13, [#allocation10]  }
  0x4b   :  { %s770_s19 = scalar_lea.vmem %s101_s14, 16  ;;  %s774_s4 = scalar_lea.vmem %s101_s14, 32 }
  0x4c   :  { %p771_p2 = scmp.ne.s32.totalorder %s101_s14, %s770_s19  ;;  %p775_p3 = scmp.lt.s32.totalorder %s101_s14, %s101_s14 }
  0x4d   :  { %p776_p4 = scmp.lt.s32.totalorder %s774_s4, %s770_s19 }
  0x4f   :  { %p777_p5 = por %p776_p4, %p775_p3 }
  0x51   :  { %p778_p6 = pnand %p777_p5, %p771_p2 }
  0x53   :  { %781 = shalt.err (!%p778_p6)
}
  0x54   :  { %103 = dma.hbm_to_vmem [thread:$0]  %s987_s9, 16, %s101_s14, [#allocation13]  }
  0x55   :  { %822 = dma.done.wait [#allocation4], 32  }
  0x56   :  { %823 = vsyncadd [#allocation4], 4294967264 }
  0x57   :  { %824 = dma.done.wait [#allocation7], 272  }
  0x58   :  { %825 = vsyncadd [#allocation7], 4294967024 }
  0x59   :  { %826 = dma.done.wait [#allocation10], 32  }
  0x5a   :  { %827 = vsyncadd [#allocation10], 4294967264 }
  0x5b   :  { %828 = dma.done.wait [#allocation13], 32  }
  0x5c   :  { %829 = vsyncadd [#allocation13], 4294967264  ;;  %v843_v1 = vmov 0.0   ;;  %vm844_vm0 = vmmov 0   ;;  %vm171_vm1 = vcmask 261120   ;;  %vm259_vm2 = vcmask 25600  }
  0x5d   :  { %585 = vmatprep.subr.bf16.mxu1 %v843_v1  ;;  %587 = vmatprep.mubr.msk.bf16.mxu1 %vm844_vm0, %v843_v1  ;;  %v147_v2 = vld [vmem:[#allocation3] sm:$0x3]  ;;  %v626_v11 = vld [vmem:[%s980_s2 + $0x8] sm:$0xff]   ;;  %vm276_vm3 = vcmask 1041408   ;;  %vm272_vm4 = vcmask 31744   ;;  %vm136_vm5 = vcmask 254976   ;;  %v127_v48 = vlaneseq }
  0x5e   :  { %577 = vmatprep.subr.bf16.mxu0 %v843_v1  ;;  %581 = vmatprep.mubr.msk.bf16.mxu0 %vm844_vm0, %v843_v1  ;;  %v942_v3 = vld [vmem:[%s978_s0] sm:$0x3]  ;;  %v217_v4 = vsel %vm171_vm1, %v147_v2, 0  ;;  %v277_v13 = vsel %vm276_vm3, %v147_v2, 0  ;;  %v628_v19 = vld [vmem:[#allocation8 + $0x8] sm:$0xff]   ;;  %v629_v28 = vld [vmem:[#allocation8] sm:$0xff]  }
  0x5f   :  { %586 = vmatpush3.bf16.xpose.msra.mxu1 %v217_v4  ;;  %v146_v5 = vpack.c.bf16 %v942_v3, %v942_v3  ;;  %578 = vmatpush3.bf16.msra.mxu0 %v626_v11  ;;  %v627_v12 = vld [vmem:[%s980_s2] sm:$0xff]   ;;  %v556_v38 = vld [vmem:[#allocation9] ss:$0 sm:$0xff]  ;;  %v387_v43 = vld [vmem:[#allocation11] sm:$0x1]  ;;  %v845_v49 = vmov 0  }
  0x60   :  { %597 = vmatprep.subr.bf16.mxu1 %v843_v1  ;;  %579 = vmatprep.subr.bf16.mxu0 %v843_v1  ;;  %v550_v29 = vld [vmem:[#allocation6] ss:$0 sm:$0xff]  ;;  %v388_v47 = vld [vmem:[#allocation2] sm:$0x1]  ;;  %v128_v50 = vshrl.u32 %v127_v48, 7  ;;  %vm144_vm7 = vcmask 253952  }
  0x61   :  { %624 = vset.pattern.permute.xlu1 %v845_v49  ;;  %625 = vset.pattern.permute.xlu0 %v845_v49  ;;  %s846_s24 = smov [#allocation16]   ;;  %vm480_vm8 = vcmask 8192  }
  0x62   :  { %vm132_vm6 = vcmp.lt.s32.totalorder %v128_v50, 2  ;;  %v396_v0 = vsub.s32 0, %v128_v50 }
  0x63   :  { %580 = vmatpush3.bf16.msra.mxu0 %v627_v12  ;;  %v135_v51 = vsel %vm132_vm6, %v942_v3, 0.0 }
  0x64   :  { %591 = vmatprep.subr.bf16.mxu0 %v843_v1  ;;  %v137_v52 = vsel %vm136_vm5, %v135_v51, 0.0 }
  0x65   :  { %v138_v53 = vrot.slane %v137_v52, 4 }
  0x66   :  { %588 = vmatmul.mubr.msk.bf16.vlgmr.msra.gmra.mxu1 %vm171_vm1, %v146_v5  ;;  %582 = vmatmul.mubr.msk.bf16.vlgmr.msra.gmra.mxu0 %vm171_vm1, %v146_v5 }
  0x67   :  { %601 = vmatprep.mubr.msk.bf16.mxu1 %vm844_vm0, %v843_v1  ;;  %592 = vmatpush3.bf16.msra.mxu0 %v277_v13  ;;  %v139_v54 = vadd.f32 %v138_v53, %v137_v52 }
  0x68   :  { %593 = vmatprep.mubr.msk.bf16.mxu0 %vm844_vm0, %v843_v1  ;;  %605 = vmatprep.subr.mxu0 %v843_v1 }
  0x69   :  { %598 = vmatpush3.bf16.msra.mxu1 %v628_v19  ;;  %v140_v55 = vrot.slane %v139_v54, 2 }
  0x6a   :  { %599 = vmatprep.subr.bf16.mxu1 %v843_v1 }
  0x6b   :  { %v141_v56 = vadd.f32 %v140_v55, %v139_v54 }
  0x6d   :  { %600 = vmatpush3.bf16.msra.mxu1 %v629_v28  ;;  %v142_v57 = vrot.slane %v141_v56, 1 }
  0x6f   :  { %v143_v58 = vadd.f32 %v142_v57, %v141_v56 }
  0x71   :  { %145 = vst.msk [vmem:[%s990_s12] sm:$0x1] %vm144_vm7, %v143_v58  ;;  %s530_s12 = sshll.u32 %s846_s24, 4  ;;  %s531_s12 = int_to_ptr.vmem [resolvable:$true] %s530_s12 }
  0x72   :  { %s782_s25 = scalar_lea.vmem %s531_s12, 16  ;;  %s786_s26 = scalar_lea.vmem %s531_s12, 32 }
  0x73   :  { %p783_p7 = scmp.ne.s32.totalorder %s531_s12, %s782_s25  ;;  %p787_p8 = scmp.lt.s32.totalorder %s531_s12, %s531_s12 }
  0x74   :  { %p788_p9 = scmp.lt.s32.totalorder %s786_s26, %s782_s25 }
  0x76   :  { %p789_p10 = por %p788_p9, %p787_p8 }
  0x78   :  { %p790_p11 = pnand %p789_p10, %p783_p7 }
 0x126   :  { %v253_v6 = vpop.f32.mrf.mxu1  ;;  %v209_v20 = vpop.f32.mrf.mxu0 }
 0x127   :  { %v260_v7 = vsel %vm259_vm2, %v253_v6, -inf  ;;  %v210_v30 = vadd.f32 %v550_v29, %v209_v20 }
 0x128   :  { %261 = vmax.xlane.f32.xlu0 %v260_v7  ;;  %v589_v8 = vpop.f32.mrf.mxu1  ;;  %v583_v21 = vpop.f32.mrf.mxu0 }
 0x12a   :  { %v256_v9 = vpop.f32.mrf.mxu1  ;;  %v212_v22 = vpop.f32.mrf.mxu0 }
 0x12c   :  { %v590_v10 = vpop.f32.mrf.mxu1  ;;  %v584_v23 = vpop.f32.mrf.mxu0 }
 0x1b1   :  { %v262_v14 = vpop.xlane.xlu0 %261 }
 0x1b2   :  { %v263_v15 = vsub.f32 %v253_v6, %v262_v14 }
 0x1b4   :  { %v264_v16 = vmul.f32 1.442695, %v263_v15 }
 0x1b6   :  { %630 = vpow2.f32 %v264_v16 }
 0x1c3   :  { %v631_v17 = vpop.eup %630 }
 0x1c4   :  { %v266_v18 = vsel %vm259_vm2, %v631_v17, 0.0 }
 0x1c5   :  { %267 = vadd.xlane.f32.xlu0 %v266_v18 }
 0x24e   :  { %v268_v24 = vpop.xlane.xlu0 %267 }
 0x24f   :  { %632 = vrcp.f32 %v268_v24 }
 0x250   :  { %634 = vtanh.f32 %v210_v30 }
 0x25c   :  { %v633_v25 = vpop.eup %632 }
 0x25d   :  { %v270_v26 = vmul.f32 %v633_v25, %v631_v17  ;;  %v635_v31 = vpop.eup %634 }
 0x25f   :  { %v271_v27 = vpack.c.bf16 %v270_v26, %v270_v26 }
 0x261   :  { %594 = vmatmul.mubr.msk.bf16.vlgmr.msra.gmra.mxu0 %vm272_vm4, %v271_v27 }
 0x262   :  { %607 = vmatprep.mubr.msk.f32.mxu0 %vm844_vm0, %v843_v1 }
 0x321   :  { %v313_v32 = vpop.f32.mrf.mxu0 }
 0x322   :  { %v319_v33 = vadd.f32 %v635_v31, %v313_v32 }
 0x323   :  { %v595_v34 = vpop.f32.mrf.mxu0 }
 0x324   :  { %v320_v35 = vpack.c.bf16 %v319_v33, %v319_v33 }
 0x325   :  { %v316_v36 = vpop.f32.mrf.mxu0 }
 0x326   :  { %602 = vmatmul.mubr.msk.bf16.vlgmr.msra.gmra.mxu1 %vm171_vm1, %v320_v35 }
 0x327   :  { %v596_v37 = vpop.f32.mrf.mxu0 }
 0x3e6   :  { %v381_v39 = vpop.f32.mrf.mxu1 }
 0x3e7   :  { %v382_v40 = vadd.f32 %v556_v38, %v381_v39 }
 0x3e8   :  { %v603_v41 = vpop.f32.mrf.mxu1 }
 0x3e9   :  { %606 = vmatpush3.xpose.msk.msra.mxu0 %vm171_vm1, %v382_v40  ;;  %v482_v42 = vadd.f32 %v382_v40, %v942_v3 }
 0x3ea   :  { %v384_v44 = vpop.f32.mrf.mxu1 }
 0x3eb   :  { %v483_v45 = vsel %vm136_vm5, %v482_v42, 0.0 }
 0x3ec   :  { %484 = vadd.xlane.f32.xlu1 %v483_v45  ;;  %v604_v46 = vpop.f32.mrf.mxu1  ;;  %608 = vmatmul.mubr.msk.f32.vlgmr.msra.gmra.mxu0 %vm171_vm1, %v387_v43 }
 0x3fd   :  { %391 = vperm.xlu1 %624, %v388_v47  }
 0x475   :  { %v485_v59 = vpop.xlane.xlu1 %484 }
 0x476   :  { %v487_v60 = vmul.f32 0.03125, %v485_v59 }
 0x478   :  { %v488_v61 = vsub.f32 %v482_v42, %v487_v60 }
 0x479   :  { %v392_v1 = vpop.permute.xlu1 %391 }
 0x47a   :  { %v489_v62 = vmul.f32 %v488_v61, %v488_v61  ;;  %v397_v2 = vrot.slane %v392_v1, %v396_v0 }
 0x47c   :  { %v490_v63 = vsel %vm136_vm5, %v489_v62, 0.0 }
 0x47d   :  { %491 = vadd.xlane.f32.xlu0 %v490_v63 }
 0x4ac   :  { %v470_v3 = vpop.f32.mrf.mxu0 }
 0x4ad   :  { %v471_v4 = vadd.f32 %v470_v3, %v397_v2 }
 0x4ae   :  { %v609_v5 = vpop.f32.mrf.mxu0 }
 0x4af   :  { %v562_v6 = vmul.f32 -1.442695, %v471_v4 }
 0x4b1   :  { %636 = vpow2.f32 %v562_v6 }
 0x4be   :  { %v637_v7 = vpop.eup %636 }
 0x4bf   :  { %v477_v8 = vadd.f32 1.0, %v637_v7 }
 0x4c1   :  { %638 = vrcp.f32 %v477_v8 }
 0x4ce   :  { %v639_v9 = vpop.eup %638 }
 0x4cf   :  { %481 = vst.msk [vmem:[#allocation16] sm:$0x1] %vm480_vm8, %v639_v9 }
 0x4d0   :  { %793 = shalt.err (!%p790_p11)
}
 0x4d1   :  { %533 = dma.vmem_to_hbm [thread:$0]  %s531_s12, 16, %s989_s11, [#allocation17]   ;;  %v563_v14 = vld [vmem:[#allocation12] ss:$0 sm:$0xff]  ;;  %v564_v16 = vld [vmem:[#allocation14] ss:$0 sm:$0xff] }
 0x4d2   :  { %s847_s28 = smov [#allocation15]  }
 0x4d3   :  { %s520_s7 = sshll.u32 %s847_s28, 4  ;;  %s521_s7 = int_to_ptr.vmem [resolvable:$true] %s520_s7 }
 0x4d4   :  { %s802_s29 = scalar_lea.vmem %s521_s7, 32  ;;  %p807_p13 = scmp.lt.s32.totalorder %s521_s7, %s521_s7 }
 0x4d5   :  { %p803_p12 = scmp.ne.s32.totalorder %s521_s7, %s802_s29  ;;  %p808_p0 = scmp.lt.s32.totalorder %s802_s29, %s802_s29 }
 0x4d7   :  { %p809_p1 = por %p808_p0, %p807_p13 }
 0x4d9   :  { %p810_p2 = pnand %p809_p1, %p803_p12 }
 0x506   :  { %v492_v10 = vpop.xlane.xlu0 %491 }
 0x507   :  { %v493_v11 = vmul.f32 0.03125, %v492_v10 }
 0x509   :  { %v494_v12 = vadd.f32 1e-05, %v493_v11 }
 0x50b   :  { %640 = vrsqrt.f32 %v494_v12 }
 0x518   :  { %v641_v13 = vpop.eup %640 }
 0x519   :  { %v496_v15 = vmul.f32 %v641_v13, %v488_v61 }
 0x51b   :  { %v504_v17 = vmul.f32 %v563_v14, %v496_v15 }
 0x51d   :  { %v512_v18 = vadd.f32 %v564_v16, %v504_v17 }
 0x51f   :  { %513 = vst.msk [vmem:[#allocation15] sm:$0x3] %vm136_vm5, %v512_v18 }
 0x520   :  { %813 = shalt.err (!%p810_p2)
}
 0x521   :  { %523 = dma.vmem_to_hbm [thread:$0]  %s521_s7, 32, %s988_s10, [#allocation5]  }
 0x522   :  { %830 = dma.done.wait [#allocation5], 32  }
 0x523   :  { %831 = vsyncadd [#allocation5], 4294967264 }
 0x524   :  { %832 = dma.done.wait [#allocation17], 16  }
 0x525   :  { %833 = vsyncadd [#allocation17], 4294967280 }
 0x526   :  { %544 = vsyncpa [#allocation4], 1 }
 0x527   :  { %545 = vsyncpa [#allocation7], 1 }
 0x528   :  { %546 = vsyncpa [#allocation10], 1 }
 0x529   :  { %547 = vsyncpa [#allocation13], 1 }
 0x52a   :  { %548 = vsyncpa [#allocation5], 1 }
 0x52b   :  { %549 = vsyncpa [#allocation17], 1 }

</bundles_post_ra>
